<compile_context>
chip_gen: v5e
topology: v5e:2x2
jax: 0.10.0
libtpu: 0.0.40
codegen_flags: <defaults>
</compile_context>

<pallas_src>
import jax
import jax.numpy as jnp
from jax.experimental import pallas as pl
from jax.experimental.pallas import tpu as pltpu


def _cross_attn_kernel(x1_ref, x2_ref, wq_ref, wkv_ref, wp_ref, bp_ref, o_ref):
    # x1_ref / x2_ref / o_ref: (nb, C, N) channels-major blocks
    #   (nb = batch elements handled per grid step)
    # wq_ref:  (C, C)   Q weight with the attention scale pre-folded
    # wkv_ref: (2C, C)  fused K/V weight
    # wp_ref:  (C, C)   output projection weight
    # bp_ref:  (C, 1)   output projection bias (column vector)
    nb, c, _ = x1_ref.shape

    wq = wq_ref[...]
    wkv = wkv_ref[...]
    wp = wp_ref[...]
    bp = bp_ref[...]

    # Static unroll over the batch elements of this grid step.
    for i in range(nb):
        x1 = x1_ref[i].astype(jnp.float32)                             # (C, N)
        x2 = x2_ref[i].astype(jnp.float32)                             # (C, N)

        # Fused projections, channels-major (PyTorch y = x @ W^T  <=>  Y^T = W @ X^T).
        q = jnp.dot(wq, x1, preferred_element_type=jnp.float32)        # (C, N), pre-scaled
        kv = jnp.dot(wkv, x2, preferred_element_type=jnp.float32)      # (2C, N)
        k = kv[:c, :]                                                  # (C, N)
        v = kv[c:, :]                                                  # (C, N)

        # Scores s[a, b] = q_a . k_b ; softmax over the lane axis b.
        s = jnp.dot(q.T, k, preferred_element_type=jnp.float32)        # (N, N)
        s = s - jnp.max(s, axis=-1, keepdims=True)
        p = jnp.exp(s)
        p = p * pl.reciprocal(jnp.sum(p, axis=-1, keepdims=True), approx=True)

        # Channels-major attention output: out_T[c, a] = sum_b v[c, b] * p[a, b].
        out_t = jnp.dot(v, p.T, preferred_element_type=jnp.float32)    # (C, N)

        # Output projection (+bias), still channels-major.
        o = jnp.dot(wp, out_t, preferred_element_type=jnp.float32) + bp
        o_ref[i] = o.astype(o_ref.dtype)


def _batch_per_grid_step(batch):
    """Fold the whole batch into one grid step on single-TensorCore chips."""
    try:
        kind = jax.devices()[0].device_kind.lower()
    except Exception:
        return 1
    single_tc = ("v5 lite" in kind or "v5e" in kind or
                 "v6 lite" in kind or "v6e" in kind)
    return batch if single_tc else 1


def cross_attention(x1, x2, params, num_heads=4):
    """x1, x2: (B, C, H, W) float32.  Returns (B, C, H, W)."""
    B, C, H, W = x1.shape
    N = H * W
    scale = float((C // num_heads) ** (-0.5))

    # Channels-major activations: pure reshapes, no transpose / extra HBM pass.
    x1r = x1.reshape(B, C, N)
    x2r = x2.reshape(B, C, N)

    # qkv weight is (3C, C): q from rows [0,C), k/v fused from rows [C,3C).
    w_qkv = params["qkv_w"]
    wq = w_qkv[:C, :] * scale                 # (C, C)  scale folded in
    wkv = w_qkv[C:, :]                        # (2C, C) fused K/V
    wp = params["proj_w"]                     # (C, C)
    bp = params["proj_b"].reshape(C, 1)       # (C, 1)

    nb = _batch_per_grid_step(B)              # B on v5e/v6e, 1 on multi-TC chips
    grid = (B // nb,)

    out = pl.pallas_call(
        _cross_attn_kernel,
        out_shape=jax.ShapeDtypeStruct((B, C, N), x1.dtype),
        grid_spec=pltpu.PrefetchScalarGridSpec(
            num_scalar_prefetch=0,
            grid=grid,
            in_specs=[
                pl.BlockSpec((nb, C, N), lambda g: (g, 0, 0)),   # x1
                pl.BlockSpec((nb, C, N), lambda g: (g, 0, 0)),   # x2
                pl.BlockSpec((C, C), lambda g: (0, 0)),          # Wq (scaled)
                pl.BlockSpec((2 * C, C), lambda g: (0, 0)),      # W_kv (fused)
                pl.BlockSpec((C, C), lambda g: (0, 0)),          # Wproj
                pl.BlockSpec((C, 1), lambda g: (0, 0)),          # proj bias
            ],
            out_specs=pl.BlockSpec((nb, C, N), lambda g: (g, 0, 0)),
        ),
        compiler_params=pltpu.CompilerParams(
            dimension_semantics=("parallel",)),
    )(x1r, x2r, wq, wkv, wp, bp)

    return out.reshape(B, C, H, W)


def _reference(x1, x2, params, num_heads=4):
    B, C, H, W = x1.shape
    N = H * W
    scale = (C // num_heads) ** (-0.5)
    x1_t = jnp.transpose(x1.reshape(B, C, N), (0, 2, 1))
    x2_t = jnp.transpose(x2.reshape(B, C, N), (0, 2, 1))
    qkv1 = x1_t @ params["qkv_w"].T
    qkv2 = x2_t @ params["qkv_w"].T
    q = qkv1[..., :C]
    k = qkv2[..., C:2 * C]
    v = qkv2[..., 2 * C:]
    attn = jax.nn.softmax(q @ jnp.swapaxes(k, -1, -2) * scale, axis=-1)
    out = attn @ v
    out = out @ params["proj_w"].T + params["proj_b"]
    return jnp.transpose(out, (0, 2, 1)).reshape(B, C, H, W)


def init_params(key, dim):
    k1, k2, k3 = jax.random.split(key, 3)
    bound = 1.0 / (dim ** 0.5)
    return {
        "qkv_w": jax.random.uniform(k1, (3 * dim, dim), jnp.float32, -bound, bound),
        "proj_w": jax.random.uniform(k2, (dim, dim), jnp.float32, -bound, bound),
        "proj_b": jax.random.uniform(k3, (dim,), jnp.float32, -bound, bound),
    }


if __name__ == "__main__":
    key = jax.random.PRNGKey(0)
    kx1, kx2, kp = jax.random.split(key, 3)

    B, C, H, W = 2, 32, 8, 8       # dim=32, num_heads=4 -> head_dim=8, N=64
    x1 = jax.random.normal(kx1, (B, C, H, W), jnp.float32)
    x2 = jax.random.normal(kx2, (B, C, H, W), jnp.float32)
    params = init_params(kp, C)

    out = cross_attention(x1, x2, params, num_heads=4)
    out = jax.block_until_ready(out)

    ref = _reference(x1, x2, params, num_heads=4)
    assert out.shape == (B, C, H, W)
    # Slightly relaxed tolerance: approximate (EUP) reciprocal in the softmax.
    assert jnp.allclose(out, ref, atol=2e-3, rtol=2e-3), "mismatch vs reference"

    print("KERNEL_OK")
</pallas_src>

<mosaic_0001>
module attributes {stable_mosaic.version = 11 : i64} {
  func.func @_cross_attn_kernel(%arg0: i32, %arg1: memref<1x32x64xf32, #tpu.memory_space<vmem>>, %arg2: memref<1x32x64xf32, #tpu.memory_space<vmem>>, %arg3: memref<32x32xf32, #tpu.memory_space<vmem>>, %arg4: memref<64x32xf32, #tpu.memory_space<vmem>>, %arg5: memref<32x32xf32, #tpu.memory_space<vmem>>, %arg6: memref<32x1xf32, #tpu.memory_space<vmem>>, %arg7: memref<1x32x64xf32, #tpu.memory_space<vmem>>) attributes {dimension_semantics = [#tpu.dimension_semantics<parallel>], iteration_bounds = array<i64: 2>, scalar_prefetch = 0 : i64, scratch_operands = 0 : i64, tpu.core_type = #tpu.core_type<tc>, window_params = [{transform_indices = @transform_0, window_bounds = array<i64: 1, 32, 64>}, {transform_indices = @transform_1, window_bounds = array<i64: 1, 32, 64>}, {pipeline_mode = #tpu.pipeline_mode<synchronous>, transform_indices = @transform_2, window_bounds = array<i64: 32, 32>}, {pipeline_mode = #tpu.pipeline_mode<synchronous>, transform_indices = @transform_3, window_bounds = array<i64: 64, 32>}, {pipeline_mode = #tpu.pipeline_mode<synchronous>, transform_indices = @transform_4, window_bounds = array<i64: 32, 32>}, {pipeline_mode = #tpu.pipeline_mode<synchronous>, transform_indices = @transform_5, window_bounds = array<i64: 32, 1>}, {transform_indices = @transform_6, window_bounds = array<i64: 1, 32, 64>}]} {
    %c0 = arith.constant 0 : index
    %c0_0 = arith.constant 0 : index
    %0 = vector.load %arg3[%c0, %c0_0] : memref<32x32xf32, #tpu.memory_space<vmem>>, vector<32x32xf32>
    %c0_1 = arith.constant 0 : index
    %c0_2 = arith.constant 0 : index
    %1 = vector.load %arg4[%c0_1, %c0_2] : memref<64x32xf32, #tpu.memory_space<vmem>>, vector<64x32xf32>
    %c0_3 = arith.constant 0 : index
    %c0_4 = arith.constant 0 : index
    %2 = vector.load %arg5[%c0_3, %c0_4] : memref<32x32xf32, #tpu.memory_space<vmem>>, vector<32x32xf32>
    %c0_5 = arith.constant 0 : index
    %c0_6 = arith.constant 0 : index
    %3 = vector.load %arg6[%c0_5, %c0_6] : memref<32x1xf32, #tpu.memory_space<vmem>>, vector<32x1xf32>
    %c0_7 = arith.constant 0 : index
    %c0_8 = arith.constant 0 : index
    %c0_9 = arith.constant 0 : index
    %4 = vector.load %arg1[%c0_7, %c0_8, %c0_9] : memref<1x32x64xf32, #tpu.memory_space<vmem>>, vector<1x32x64xf32>
    %5 = vector.shape_cast %4 : vector<1x32x64xf32> to vector<32x64xf32>
    %c0_10 = arith.constant 0 : index
    %c0_11 = arith.constant 0 : index
    %c0_12 = arith.constant 0 : index
    %6 = vector.load %arg2[%c0_10, %c0_11, %c0_12] : memref<1x32x64xf32, #tpu.memory_space<vmem>>, vector<1x32x64xf32>
    %7 = vector.shape_cast %6 : vector<1x32x64xf32> to vector<32x64xf32>
    %cst = arith.constant dense<0.000000e+00> : vector<32x64xf32>
    %8 = tpu.matmul %0, %5, %cst {dimension_numbers = #tpu.dot_dimension_numbers<[1], [0], [0], [1], [0, 0, 1, 1], [], []>} : vector<32x32xf32>, vector<32x64xf32>, vector<32x64xf32> -> vector<32x64xf32>
    %cst_13 = arith.constant dense<0.000000e+00> : vector<64x64xf32>
    %9 = tpu.matmul %1, %7, %cst_13 {dimension_numbers = #tpu.dot_dimension_numbers<[1], [0], [0], [1], [0, 0, 1, 1], [], []>} : vector<64x32xf32>, vector<32x64xf32>, vector<64x64xf32> -> vector<64x64xf32>
    %10 = vector.extract_strided_slice %9 {offsets = [0, 0], sizes = [32, 64], strides = [1, 1]} : vector<64x64xf32> to vector<32x64xf32>
    %11 = vector.extract_strided_slice %9 {offsets = [32, 0], sizes = [32, 64], strides = [1, 1]} : vector<64x64xf32> to vector<32x64xf32>
    %12 = tpu.transpose %8, [1, 0] : vector<32x64xf32> -> vector<64x32xf32>
    %cst_14 = arith.constant dense<0.000000e+00> : vector<64x64xf32>
    %13 = tpu.matmul %12, %10, %cst_14 {dimension_numbers = #tpu.dot_dimension_numbers<[1], [0], [0], [1], [0, 0, 1, 1], [], []>} : vector<64x32xf32>, vector<32x64xf32>, vector<64x64xf32> -> vector<64x64xf32>
    %cst_15 = arith.constant dense<0xFF800000> : vector<64xf32>
    %14 = vector.multi_reduction <maximumf>, %13, %cst_15 [1] : vector<64x64xf32> to vector<64xf32>
    %15 = vector.shape_cast %14 : vector<64xf32> to vector<64x1xf32>
    %16 = vector.broadcast %15 : vector<64x1xf32> to vector<64x64xf32>
    %17 = arith.subf %13, %16 : vector<64x64xf32>
    %18 = math.exp %17 : vector<64x64xf32>
    %cst_16 = arith.constant dense<0.000000e+00> : vector<64xf32>
    %19 = vector.multi_reduction <add>, %18, %cst_16 [1] : vector<64x64xf32> to vector<64xf32>
    %20 = vector.shape_cast %19 : vector<64xf32> to vector<64x1xf32>
    %21 = tpu.reciprocal %20 {approx = true} : vector<64x1xf32> -> vector<64x1xf32>
    %22 = vector.broadcast %21 : vector<64x1xf32> to vector<64x64xf32>
    %23 = arith.mulf %18, %22 : vector<64x64xf32>
    %24 = tpu.transpose %23, [1, 0] : vector<64x64xf32> -> vector<64x64xf32>
    %cst_17 = arith.constant dense<0.000000e+00> : vector<32x64xf32>
    %25 = tpu.matmul %11, %24, %cst_17 {dimension_numbers = #tpu.dot_dimension_numbers<[1], [0], [0], [1], [0, 0, 1, 1], [], []>} : vector<32x64xf32>, vector<64x64xf32>, vector<32x64xf32> -> vector<32x64xf32>
    %cst_18 = arith.constant dense<0.000000e+00> : vector<32x64xf32>
    %26 = tpu.matmul %2, %25, %cst_18 {dimension_numbers = #tpu.dot_dimension_numbers<[1], [0], [0], [1], [0, 0, 1, 1], [], []>} : vector<32x32xf32>, vector<32x64xf32>, vector<32x64xf32> -> vector<32x64xf32>
    %27 = vector.broadcast %3 : vector<32x1xf32> to vector<32x64xf32>
    %28 = arith.addf %26, %27 : vector<32x64xf32>
    %c0_19 = arith.constant 0 : index
    %c0_20 = arith.constant 0 : index
    %c0_21 = arith.constant 0 : index
    %29 = vector.load %arg7[%c0_19, %c0_20, %c0_21] : memref<1x32x64xf32, #tpu.memory_space<vmem>>, vector<1x32x64xf32>
    %30 = vector.shape_cast %29 : vector<1x32x64xf32> to vector<32x64xf32>
    %31 = vector.shape_cast %28 : vector<32x64xf32> to vector<1x32x64xf32>
    tpu.vector_store %arg7[%c0_19, %c0_20, %c0_21], %31 {strides = array<i32>} : memref<1x32x64xf32, #tpu.memory_space<vmem>>, vector<1x32x64xf32>,
    return
  }
  func.func @transform_0(%arg0: i32) -> (i32, i32, i32) {
    %c0_i32 = arith.constant 0 : i32
    %c0_i32_0 = arith.constant 0 : i32
    %c0_i32_1 = arith.constant 0 : i32
    return %arg0, %c0_i32, %c0_i32_0 : i32, i32, i32
  }
  func.func @transform_1(%arg0: i32) -> (i32, i32, i32) {
    %c0_i32 = arith.constant 0 : i32
    %c0_i32_0 = arith.constant 0 : i32
    %c0_i32_1 = arith.constant 0 : i32
    return %arg0, %c0_i32, %c0_i32_0 : i32, i32, i32
  }
  func.func @transform_2(%arg0: i32) -> (i32, i32) {
    %c0_i32 = arith.constant 0 : i32
    %c0_i32_0 = arith.constant 0 : i32
    %c0_i32_1 = arith.constant 0 : i32
    return %c0_i32, %c0_i32_0 : i32, i32
  }
  func.func @transform_3(%arg0: i32) -> (i32, i32) {
    %c0_i32 = arith.constant 0 : i32
    %c0_i32_0 = arith.constant 0 : i32
    %c0_i32_1 = arith.constant 0 : i32
    return %c0_i32, %c0_i32_0 : i32, i32
  }
  func.func @transform_4(%arg0: i32) -> (i32, i32) {
    %c0_i32 = arith.constant 0 : i32
    %c0_i32_0 = arith.constant 0 : i32
    %c0_i32_1 = arith.constant 0 : i32
    return %c0_i32, %c0_i32_0 : i32, i32
  }
  func.func @transform_5(%arg0: i32) -> (i32, i32) {
    %c0_i32 = arith.constant 0 : i32
    %c0_i32_0 = arith.constant 0 : i32
    %c0_i32_1 = arith.constant 0 : i32
    return %c0_i32, %c0_i32_0 : i32, i32
  }
  func.func @transform_6(%arg0: i32) -> (i32, i32, i32) {
    %c0_i32 = arith.constant 0 : i32
    %c0_i32_0 = arith.constant 0 : i32
    %c0_i32_1 = arith.constant 0 : i32
    return %arg0, %c0_i32, %c0_i32_0 : i32, i32, i32
  }
}

</mosaic_0001>

<bundles_post_ra>
// kernel: tpu_custom_call.1
= control target key start
LH: loop header
LB: loop body
LE: loop exit
PB: predicated region body
PF: predicated region fallthrough
CT: control target
= control target key end

     0   :  { %11 = vsyncpa [#allocation3], 0  ;;  %s1468_s0 = inlined_call_operand.vmem [shape: f32[2,32,64], index: 0, kind: input, shape index: {}]   ;;  %s1469_s1 = inlined_call_operand.hbm [shape: f32[2,32,64], index: 1, kind: input, shape index: {}]   ;;  %s1470_s2 = inlined_call_operand.vmem [shape: f32[32,32], index: 2, kind: input, shape index: {}]   ;;  %s1471_s3 = inlined_call_operand.vmem [shape: f32[64,32], index: 3, kind: input, shape index: {}]   ;;  %s1472_s4 = inlined_call_operand.hbm [shape: f32[32,32], index: 4, kind: input, shape index: {}]   ;;  %s1473_s5 = inlined_call_operand.vmem [shape: f32[32,1], index: 5, kind: input, shape index: {}]   ;;  %s1474_s6 = inlined_call_operand.hbm [shape: f32[2,32,64], index: 6, kind: output, shape index: {}]  }
   0x1   :  { %13 = vsyncpa [#allocation3 + $0x1], 0 }
   0x2   :  { %14 = vsyncpa [#allocation6], 0 }
   0x3   :  { %15 = vsyncpa [#allocation4], 0 }
   0x4   :  { %17 = vsyncpa [#allocation4 + $0x1], 0  ;;  %s1199_s21 = smov 0   ;;  %s1201_s22 = smov 0  }
   0x5   :  { %s1203_s23 = smov 0   ;;  %s1205_s24 = smov 0  }
   0x6 LB: > { %s1220_s25 = sadd.s32 4294967295, %s1156_s24   ;;  %s871_s26 = sadd.s32 4294967294, %s1156_s24   ;;  %s1156_s24 = sphi %s1205_s24, %s1488_s24   ;;  %s1152_s23 = sphi %s1203_s23, %s1487_s23   ;;  %s1148_s22 = sphi %s1201_s22, %s1486_s22   ;;  %s1144_s21 = sphi %s1199_s21, %s1485_s21  }
   0x7   : > { %p69_p0 = scmp.ne.s32.totalorder %s1148_s22, %s1144_s21  ;;  %p70_p1 = scmp.eq.s32.totalorder %s1220_s25, 0 }
   0x8   : > { %p177_p2 = scmp.eq.s32.totalorder %s1220_s25, 1  ;;  %p183_p3 = scmp.eq.s32.totalorder %s871_s26, 1 }
   0x9   : > { %p1229_p4 = por %p70_p1, %p69_p0  ;;  %p872_p5 = scmp.ge.s32.totalorder %s1156_s24, 1 }
   0xa   : > { %p1234_p6 = por %p183_p3, %p69_p0  ;;  %p190_p7 = scmp.lt.s32.totalorder %s1156_s24, 3 }
   0xb   : > { %s207_s7 = sshll.u32 %s1472_s4, 4  ;;  %s1158_s9 = smov [#allocation5]   ;;  %s208_s7 = int_to_ptr.hbm [resolvable:$true] %s207_s7 }
   0xc   : > { %p1242_p8 = pnand %p872_p5, %p190_p7  ;;  %s209_s10 = sshll.u32 %s1158_s9, 4  ;;  %s210_s10 = int_to_ptr.vmem [resolvable:$true] %s209_s10 }
   0xd   : > { %s1252_s11 = sadd.s32 1, %s1156_s24   ;;  %s1475_s12 = smov 128  }
   0xe   : > { %p936_p9 = pneg %p1242_p8  ;;  %s1476_s13 = smov 8  }
   0xf   : > { %s53_s14 = ssub.s32 %s1156_s24, %s1252_s11  ;;  %s56_s15 = sadd.s32 1, %s1152_s23 }
  0x10   : > { %p937_p10 = pnand %p936_p9, %p70_p1  ;;  %p54_p12 = scmp.eq.s32.totalorder %s53_s14, 0 }
  0x11   : > { %p63_p13 = scmp.ne.s32.totalorder %s1152_s23, %s1148_s22  ;;  %p64_p0 = scmp.eq.s32.totalorder %s1156_s24, 0 }
  0x12   : > { %939 = dma.hbm_to_vmem [thread:$0]  (!%p937_p10), %s208_s7, 512, %s210_s10, [#allocation6], %s1475_s12, %s1475_s12, %s1476_s13  }
  0x13   : > { %s1264_s16 = scalar_select %p54_p12, %s1152_s23, %s56_s15  }
  0x14   : > { %p1268_p3 = por %p177_p2, %p63_p13  ;;  %p949_p5 = scmp.lt.s32.totalorder %s1156_s24, 2 }
  0x15   : > { %s234_s18 = sand.u32 1, %s1152_s23   ;;  %s925_s19 = sshll.u32 %s1156_s24, 5 }
  0x16   : > { %p65_p7 = por %p64_p0, %p63_p13  ;;  %s875_s20 = sshll.u32 %s234_s18, 5 }
  0x17   : > { %s243_s30 = scalar_lea.hbm %s1469_s1, %s925_s19  ;;  %s238_s9 = scalar_lea.vmem [#allocation2], %s875_s20 }
  0x18   : > { %s244_s7 = sshll.u32 %s243_s30, 4  ;;  %s246_s10 = sshll.u32 %s238_s9, 4  ;;  %s245_s7 = int_to_ptr.hbm [resolvable:$true] %s244_s7  ;;  %s247_s10 = int_to_ptr.vmem [resolvable:$true] %s246_s10 }
  0x19   : > { %p1278_p9 = pnand %p949_p5, %p65_p7  ;;  %s235_s15 = scalar_lea.sflag [#allocation3], %s234_s18 }
  0x1a   : > { %s1056_s12 = sshra.s32 %s245_s7, 4  ;;  %s1063_s20 = scalar_lea.hbm %s1469_s1, 64  ;;  %s1057_s12 = int_to_ptr.hbm [resolvable:$true] %s1056_s12 }
  0x1b   : > { %s1058_s13 = scalar_lea.hbm %s1057_s12, 32  ;;  %p1060_p10 = pneg %p1278_p9 }
  0x1c   : > { %p1059_p2 = scmp.ne.s32.totalorder %s1057_s12, %s1058_s13  ;;  %p1064_p0 = scmp.lt.s32.totalorder %s1057_s12, %s1469_s1 }
  0x1d   : > { %p1065_p5 = scmp.lt.s32.totalorder %s1063_s20, %s1058_s13 }
  0x1e   : > { %p1061_p12 = pnand %p1060_p10, %p1059_p2 }
  0x1f   : > { %p1066_p7 = por %p1065_p5, %p1064_p0 }
  0x20   : > { %p1062_p13 = pneg %p1061_p12 }
  0x22   : > { %p1067_p11 = pnand %p1066_p7, %p1062_p13 }
  0x24   : > { %1070 = shalt.err (!%p1067_p11)
}
  0x25   : > { %s1482_s18 = smov 8   ;;  %s1483_s9 = smov 128  }
  0x26   : > { %943 = dma.hbm_to_vmem [thread:$0]  (!%p1278_p9), %s245_s7, 512, %s247_s10, %s235_s15, %s1483_s9, %s1483_s9, %s1482_s18  }
  0x27   : > { %258 = sbr.rel (%p1242_p8) target bundleno = 1148 (0x47c), region = 44  ;;  %s1298_s19 = sand.u32 (!%p1242_p8), 1, %s1148_s22  }
  0x28   : > { %s879_s12 = sshll.u32 (!%p1242_p8), %s1298_s19, 5  ;;  %s261_s13 = scalar_lea.sflag (!%p1242_p8), [#allocation3], %s1298_s19 }
  0x29   : > { %s264_s26 = scalar_lea.vmem (!%p1242_p8), [#allocation2], %s879_s12 }
  0x2c   : > { %1131 = dma.done.wait (%p1229_p4), %s261_s13, 512  }
  0x2d   : > { %1133 = vsyncadd (%p1229_p4), %s261_s13, 4294966784 }
  0x2e   : > { %1135 = dma.done.wait (%p70_p1), [#allocation6], 512  }
  0x2f   : > { %1137 = vsyncadd (%p70_p1), [#allocation6], 4294966784  ;;  %p304_p8 = scmp.lt.s32.totalorder %s1220_s25, 1  ;;  %v336_v3 = vld [vmem:[%s264_s26 + $0x18] sm:$0xff]  ;;  %v335_v4 = vld [vmem:[%s264_s26 + $0x10] sm:$0xff]  ;;  %vm337_vm0 = vcmask 261120  }
  0x30   : > { %415 = vmatpush.msra.mxu1 %v336_v3  ;;  %v334_v6 = vld [vmem:[%s264_s26 + $0x8] sm:$0xff]  ;;  %v309_v7 = vld [vmem:[%s1470_s2] sm:$0xff]  ;;  %v311_v12 = vld [vmem:[%s1470_s2 + $0x10] sm:$0xff]  ;;  %vm541_vm1 = vcmask 523264   ;;  %s303_s13 = scalar_lea.vmem [#allocation7], %s879_s12  ;;  %s1106_s30 = scalar_lea.hbm %s1474_s6, 64 }
  0x31   : > { %s305_s8 = scalar_select %p304_p8, %s1220_s25, 1  ;;  %v333_v8 = vld [vmem:[%s264_s26] sm:$0xff]  ;;  %v310_v10 = vld [vmem:[%s1470_s2 + $0x8] sm:$0xff]  ;;  %v315_v13 = vld [vmem:[%s1471_s3 + $0x10] sm:$0xff] }
  0x32   : > { %416 = vmatpush.msra.mxu1 %v335_v4  ;;  %v313_v9 = vld [vmem:[%s1471_s3] sm:$0xff]  ;;  %v314_v11 = vld [vmem:[%s1471_s3 + $0x8] sm:$0xff]  ;;  %v312_v14 = vld [vmem:[%s1470_s2 + $0x18] sm:$0xff]  ;;  %s773_s12 = sshll.u32 %s303_s13, 4  ;;  %s774_s12 = int_to_ptr.vmem [resolvable:$true] %s773_s12 }
  0x33   : > { %s926_s7 = sshll.u32 %s305_s8, 5  ;;  %v316_v15 = vld [vmem:[%s1471_s3 + $0x18] sm:$0xff]  ;;  %v317_v63 = vld [vmem:[%s1471_s3 + $0x20] sm:$0xff]  ;;  %s927_s8 = sshll.u32 %s1220_s25, 5 }
  0x34   : > { %s308_s15 = scalar_lea.vmem %s1468_s0, %s926_s7  ;;  %417 = vmatpush.msra.mxu1 %v334_v6  ;;  %s772_s10 = scalar_lea.hbm %s1474_s6, %s927_s8 }
  0x35   : > { %v332_v0 = vld [vmem:[%s308_s15 + $0x18] sm:$0xff]  ;;  %v331_v1 = vld [vmem:[%s308_s15 + $0x10] sm:$0xff]  ;;  %v330_v2 = vld [vmem:[%s308_s15 + $0x8] sm:$0xff]  ;;  %s775_s14 = sshll.u32 %s772_s10, 4  ;;  %s776_s14 = int_to_ptr.hbm [resolvable:$true] %s775_s14 }
  0x36   : > { %362 = vmatpush.msra.mxu0 %v332_v0  ;;  %v329_v5 = vld [vmem:[%s308_s15] sm:$0xff]  ;;  %418 = vmatpush.msra.mxu1 %v333_v8  ;;  %s761_s15 = scalar_lea.sflag [#allocation4], %s1298_s19  ;;  %s1100_s25 = sshra.s32 %s776_s14, 4  ;;  %s1101_s25 = int_to_ptr.hbm [resolvable:$true] %s1100_s25 }
  0x37   : > { %888 = vmatmul.msk.f32.vlgmr.msra.gmra.mxu1 %vm337_vm0, %v313_v9  ;;  %s1102_s27 = scalar_lea.hbm %s1101_s25, 32  ;;  %p1107_p9 = scmp.lt.s32.totalorder %s1101_s25, %s1474_s6 }
  0x38   : > { %363 = vmatpush.msra.mxu0 %v331_v1  ;;  %p1103_p1 = scmp.ne.s32.totalorder %s1101_s25, %s1102_s27  ;;  %p1108_p2 = scmp.lt.s32.totalorder %s1106_s30, %s1102_s27 }
  0x3a   : > { %364 = vmatpush.msra.mxu0 %v330_v2  ;;  %p1104_p4 = pnand %p1103_p1, %p1268_p3  ;;  %p1109_p10 = por %p1108_p2, %p1107_p9 }
  0x3c   : > { %365 = vmatpush.msra.mxu0 %v329_v5  ;;  %p1105_p11 = pneg %p1104_p4 }
  0x3d   : > { %884 = vmatmul.msk.f32.vlgmr.msra.gmra.mxu0 %vm337_vm0, %v309_v7  ;;  %v318_v7 = vld [vmem:[%s1471_s3 + $0x28] sm:$0xff] }
  0x3e   : > { %p1110_p12 = pnand %p1109_p10, %p1105_p11 }
  0x3f   : > { %889 = vmatmul.msk.f32.gmra.mxu1 %vm337_vm0, %v314_v11 }
  0x45   : > { %885 = vmatmul.msk.f32.gmra.mxu0 %vm337_vm0, %v310_v10 }
  0x47   : > { %890 = vmatmul.msk.f32.gmra.mxu1 %vm337_vm0, %v315_v13 }
  0x4d   : > { %886 = vmatmul.msk.f32.gmra.mxu0 %vm337_vm0, %v311_v12 }
  0x4f   : > { %891 = vmatmul.msk.f32.gmra.mxu1 %vm337_vm0, %v316_v15 }
  0x55   : > { %887 = vmatmul.msk.f32.gmra.mxu0 %vm337_vm0, %v312_v14 }
  0x57   : > { %892 = vmatmul.msk.f32.gmra.mxu1 %vm337_vm0, %v317_v63  ;;  %v321_v63 = vld [vmem:[#allocation5] sm:$0xff] }
  0x5f   : > { %893 = vmatmul.msk.f32.gmra.mxu1 %vm337_vm0, %v318_v7 }
  0xb4   : > { %v420_v20 = vpop.f32.mrf.mxu1 }
  0xba   : > { %v367_v16 = vpop.f32.mrf.mxu0 }
  0xbb   : > { %444 = vxpose.xlu0.b32.start [1/4] (short) (narrow) %v367_v16, 64 }
  0xbc   : > { %v423_v21 = vpop.f32.mrf.mxu1 }
  0xc2   : > { %v370_v17 = vpop.f32.mrf.mxu0 }
  0xc3   : > { %445 = vxpose.xlu0.b32.cont [2/4] (short) (narrow) %v370_v17, 64 }
  0xc4   : > { %v426_v22 = vpop.f32.mrf.mxu1 }
  0xca   : > { %v373_v18 = vpop.f32.mrf.mxu0 }
  0xcb   : > { %446 = vxpose.xlu0.b32.cont [3/4] (short) (narrow) %v373_v18, 64  ;;  %v319_v18 = vld [vmem:[%s1471_s3 + $0x30] sm:$0xff] }
  0xcc   : > { %v429_v23 = vpop.f32.mrf.mxu1  ;;  %894 = vmatmul.msk.f32.gmra.mxu1 %vm337_vm0, %v319_v18 }
  0xcd   : > { %512 = vmatpush.msra.mxu2 %v429_v23 }
  0xcf   : > { %513 = vmatpush.msra.mxu2 %v426_v22 }
  0xd1   : > { %514 = vmatpush.msra.mxu2 %v423_v21 }
  0xd2   : > { %v376_v19 = vpop.f32.mrf.mxu0 }
  0xd3   : > { %447 = vxpose.xlu0.b32.end [4/4] (short) (narrow) %v376_v19, 64  ;;  %515 = vmatpush.msra.mxu2 %v420_v20 }
 0x15f   : > { %v460_v24 = vpop.trf.xlu0 }
 0x160   : > { %896 = vmatmul.msk.f32.vlgmr.msra.gmra.mxu2 %vm337_vm0, %v460_v24  ;;  %v320_v24 = vld [vmem:[%s1471_s3 + $0x38] sm:$0xff] }
 0x161   : > { %895 = vmatmul.msk.f32.gmra.mxu1 %vm337_vm0, %v320_v24 }
 0x167   : > { %v461_v25 = vpop.trf.xlu0 }
 0x168   : > { %897 = vmatmul.msk.f32.gmra.mxu2 %vm337_vm0, %v461_v25 }
 0x16f   : > { %v462_v26 = vpop.trf.xlu0 }
 0x170   : > { %898 = vmatmul.msk.f32.gmra.mxu2 %vm337_vm0, %v462_v26 }
 0x177   : > { %v463_v27 = vpop.trf.xlu0 }
 0x178   : > { %899 = vmatmul.msk.f32.gmra.mxu2 %vm337_vm0, %v463_v27 }
 0x17f   : > { %v464_v28 = vpop.trf.xlu0 }
 0x180   : > { %900 = vmatmul.msk.f32.gmra.mxu2 %vm337_vm0, %v464_v28 }
 0x187   : > { %v465_v29 = vpop.trf.xlu0 }
 0x188   : > { %901 = vmatmul.msk.f32.gmra.mxu2 %vm337_vm0, %v465_v29 }
 0x18f   : > { %v466_v30 = vpop.trf.xlu0 }
 0x190   : > { %902 = vmatmul.msk.f32.gmra.mxu2 %vm337_vm0, %v466_v30 }
 0x197   : > { %v467_v31 = vpop.trf.xlu0 }
 0x198   : > { %903 = vmatmul.msk.f32.gmra.mxu2 %vm337_vm0, %v467_v31 }
 0x1e3   : > { %v1357_v32 = vpop.f32.mrf.mxu2 }
 0x1e4   : > { %v542_v44 = vsel %vm541_vm1, %v1357_v32, -inf }
 0x1eb   : > { %v1359_v33 = vpop.f32.mrf.mxu2 }
 0x1ec   : > { %v545_v47 = vsel %vm541_vm1, %v1359_v33, -inf }
 0x1f3   : > { %v523_v34 = vpop.f32.mrf.mxu2 }
 0x1f4   : > { %v548_v42 = vsel %vm541_vm1, %v523_v34, -inf }
 0x1fb   : > { %v526_v35 = vpop.f32.mrf.mxu2 }
 0x1fc   : > { %v551_v46 = vsel %vm541_vm1, %v526_v35, -inf }
 0x203   : > { %v529_v36 = vpop.f32.mrf.mxu2 }
 0x204   : > { %v554_v40 = vsel %vm541_vm1, %v529_v36, -inf }
 0x20b   : > { %v532_v37 = vpop.f32.mrf.mxu2 }
 0x20c   : > { %v557_v38 = vsel %vm541_vm1, %v532_v37, -inf }
 0x20d   : > { %558 = vmax.xlane.f32.xlu2 %v557_v38 }
 0x213   : > { %v535_v39 = vpop.f32.mrf.mxu2 }
 0x214   : > { %v560_v45 = vsel %vm541_vm1, %v535_v39, -inf }
 0x215   : > { %555 = vmax.xlane.f32.xlu2 %v554_v40 }
 0x21b   : > { %v538_v41 = vpop.f32.mrf.mxu2 }
 0x21c   : > { %v563_v43 = vsel %vm541_vm1, %v538_v41, -inf }
 0x21d   : > { %549 = vmax.xlane.f32.xlu2 %v548_v42  ;;  %564 = vmax.xlane.f32.xlu1 %v563_v43 }
 0x225   : > { %543 = vmax.xlane.f32.xlu2 %v542_v44  ;;  %561 = vmax.xlane.f32.xlu1 %v560_v45 }
 0x22d   : > { %552 = vmax.xlane.f32.xlu1 %v551_v46 }
 0x235   : > { %546 = vmax.xlane.f32.xlu1 %v545_v47 }
 0x280   : > { %v559_v48 = vpop.xlane.xlu2 %558 }
 0x281   : > { %v571_v49 = vsub.f32 %v532_v37, %v559_v48 }
 0x283   : > { %v584_v50 = vmul.f32 1.442695, %v571_v49 }
 0x285   : > { %994 = vpow2.f32 %v584_v50  ;;  %v432_v50 = vpop.f32.mrf.mxu1 }
 0x288   : > { %v556_v56 = vpop.xlane.xlu2 %555 }
 0x289   : > { %v570_v61 = vsub.f32 %v529_v36, %v556_v56 }
 0x28b   : > { %v1371_v51 = vpop.eup %994  ;;  %v582_v1 = vmul.f32 1.442695, %v570_v61 }
 0x28c   : > { %v605_v52 = vsel %vm541_vm1, %v1371_v51, 0.0 }
 0x28d   : > { %606 = vadd.xlane.f32.xlu2 %v605_v52 }
 0x290   : > { %v565_v53 = vpop.xlane.xlu1 %564  ;;  %v550_v0 = vpop.xlane.xlu2 %549 }
 0x291   : > { %v573_v54 = vsub.f32 %v538_v41, %v565_v53  ;;  %v568_v6 = vsub.f32 %v523_v34, %v550_v0  ;;  %v435_v53 = vpop.f32.mrf.mxu1  ;;  %v327_v0 = vld [vmem:[%s1473_s5 + $0x10] sm:$0xff] }
 0x293   : > { %v588_v55 = vmul.f32 1.442695, %v573_v54  ;;  %v578_v9 = vmul.f32 1.442695, %v568_v6 }
 0x295   : > { %996 = vpow2.f32 %v588_v55 }
 0x298   : > { %v562_v57 = vpop.xlane.xlu1 %561  ;;  %v544_v11 = vpop.xlane.xlu2 %543 }
 0x299   : > { %v572_v58 = vsub.f32 %v535_v39, %v562_v57  ;;  %v566_v16 = vsub.f32 %v1357_v32, %v544_v11  ;;  %v438_v54 = vpop.f32.mrf.mxu1 }
 0x29b   : > { %v586_v59 = vmul.f32 1.442695, %v572_v58  ;;  %v997_v60 = vpop.eup %996  ;;  %v574_v20 = vmul.f32 1.442695, %v566_v16 }
 0x29c   : > { %v611_v62 = vsel %vm541_vm1, %v997_v60, 0.0 }
 0x29d   : > { %998 = vpow2.f32 %v586_v59  ;;  %612 = vadd.xlane.f32.xlu0 %v611_v62  ;;  %v1161_v59 = vmov 0   ;;  %v325_v62 = vld [vmem:[%s1473_s5] sm:$0xff] }
 0x29e   : > { %1000 = vpow2.f32 %v582_v1  ;;  %992 = vset.pattern.permute.xlu1 %v1161_v59  ;;  %991 = vset.pattern.permute.xlu2 %v1161_v59  ;;  %v322_v1 = vld [vmem:[#allocation5 + $0x8] sm:$0xff] }
 0x29f   : > { %993 = vset.pattern.permute.xlu0 %v1161_v59 }
 0x2a0   : > { %v553_v2 = vpop.xlane.xlu1 %552 }
 0x2a1   : > { %v569_v3 = vsub.f32 %v526_v35, %v553_v2  ;;  %v441_v55 = vpop.f32.mrf.mxu1  ;;  %v328_v2 = vld [vmem:[%s1473_s5 + $0x18] sm:$0xff] }
 0x2a3   : > { %v580_v4 = vmul.f32 1.442695, %v569_v3  ;;  %v999_v5 = vpop.eup %998  ;;  %v323_v3 = vld [vmem:[#allocation5 + $0x10] sm:$0xff] }
 0x2a4   : > { %v608_v8 = vsel %vm541_vm1, %v999_v5, 0.0  ;;  %v1001_v13 = vpop.eup %1000 }
 0x2a5   : > { %1002 = vpow2.f32 %v580_v4  ;;  %609 = vadd.xlane.f32.xlu1 %v608_v8  ;;  %v602_v19 = vsel %vm541_vm1, %v1001_v13, 0.0  ;;  %v324_v4 = vld [vmem:[#allocation5 + $0x18] sm:$0xff] }
 0x2a6   : > { %1004 = vpow2.f32 %v578_v9 }
 0x2a8   : > { %v547_v10 = vpop.xlane.xlu1 %546 }
 0x2a9   : > { %v567_v12 = vsub.f32 %v1359_v33, %v547_v10 }
 0x2ab   : > { %v1003_v14 = vpop.eup %1002  ;;  %v576_v15 = vmul.f32 1.442695, %v567_v12 }
 0x2ac   : > { %v599_v17 = vsel %vm541_vm1, %v1003_v14, 0.0  ;;  %v1005_v21 = vpop.eup %1004 }
 0x2ad   : > { %1006 = vpow2.f32 %v576_v15  ;;  %600 = vadd.xlane.f32.xlu2 %v599_v17  ;;  %603 = vadd.xlane.f32.xlu1 %v602_v19  ;;  %v596_v25 = vsel %vm541_vm1, %v1005_v21, 0.0 }
 0x2ae   : > { %1008 = vpow2.f32 %v574_v20 }
 0x2b3   : > { %v1007_v22 = vpop.eup %1006 }
 0x2b4   : > { %v593_v23 = vsel %vm541_vm1, %v1007_v22, 0.0  ;;  %v1009_v26 = vpop.eup %1008 }
 0x2b5   : > { %594 = vadd.xlane.f32.xlu2 %v593_v23  ;;  %597 = vadd.xlane.f32.xlu1 %v596_v25  ;;  %v590_v27 = vsel %vm541_vm1, %v1009_v26, 0.0 }
 0x2bd   : > { %591 = vadd.xlane.f32.xlu1 %v590_v27 }
 0x2cd   : > { %697 = vperm.xlu2 %991, %v325_v62  }
 0x2d5   : > { %707 = vperm.xlu2 %991, %v327_v0  }
 0x2dd   : > { %712 = vperm.xlu2 %991, %v328_v2  }
 0x300   : > { %v607_v30 = vpop.xlane.xlu2 %606 }
 0x310   : > { %v613_v28 = vpop.xlane.xlu0 %612 }
 0x311   : > { %1010 = vrcp.f32 %v613_v28 }
 0x317   : > { %v1011_v29 = vpop.eup %1010 }
 0x318   : > { %v610_v31 = vpop.xlane.xlu1 %609  ;;  %v629_v32 = vmul.f32 %v1011_v29, %v997_v60  ;;  %v326_v60 = vld [vmem:[%s1473_s5 + $0x8] sm:$0xff] }
 0x319   : > { %1012 = vrcp.f32 %v610_v31  ;;  %702 = vperm.xlu1 %992, %v326_v60  }
 0x31a   : > { %904 = vmatpush.xpose.msk.msra.mxu3 %vm541_vm1, %v629_v32  ;;  %1014 = vrcp.f32 %v607_v30 }
 0x31f   : > { %v1013_v33 = vpop.eup %1012 }
 0x320   : > { %v601_v34 = vpop.xlane.xlu2 %600  ;;  %v604_v35 = vpop.xlane.xlu1 %603  ;;  %v628_v36 = vmul.f32 %v1013_v33, %v999_v5 }
 0x321   : > { %v1015_v37 = vpop.eup %1014  ;;  %1016 = vrcp.f32 %v604_v35 }
 0x322   : > { %905 = vmatpush.xpose.msk.msra.mxu3 %vm541_vm1, %v628_v36  ;;  %1018 = vrcp.f32 %v601_v34  ;;  %v627_v38 = vmul.f32 %v1015_v37, %v1371_v51 }
 0x326   : > { %906 = vmatpush.xpose.msk.msra.mxu3 %vm541_vm1, %v627_v38 }
 0x327   : > { %v1017_v39 = vpop.eup %1016 }
 0x328   : > { %v595_v40 = vpop.xlane.xlu2 %594  ;;  %v598_v41 = vpop.xlane.xlu1 %597  ;;  %v626_v42 = vmul.f32 %v1017_v39, %v1001_v13 }
 0x329   : > { %v1019_v43 = vpop.eup %1018  ;;  %1020 = vrcp.f32 %v598_v41 }
 0x32a   : > { %907 = vmatpush.xpose.msk.msra.mxu3 %vm541_vm1, %v626_v42  ;;  %1022 = vrcp.f32 %v595_v40  ;;  %v625_v44 = vmul.f32 %v1019_v43, %v1003_v14 }
 0x32e   : > { %908 = vmatpush.xpose.msk.msra.mxu3 %vm541_vm1, %v625_v44 }
 0x32f   : > { %v1021_v45 = vpop.eup %1020 }
 0x330   : > { %v592_v46 = vpop.xlane.xlu1 %591  ;;  %v624_v47 = vmul.f32 %v1021_v45, %v1005_v21  ;;  %v1023_v48 = vpop.eup %1022 }
 0x331   : > { %1024 = vrcp.f32 %v592_v46  ;;  %v623_v49 = vmul.f32 %v1023_v48, %v1007_v22  ;;  %v698_v6 = vpop.permute.xlu2 %697 }
 0x332   : > { %909 = vmatpush.xpose.msk.msra.mxu3 %vm541_vm1, %v624_v47 }
 0x336   : > { %910 = vmatpush.xpose.msk.msra.mxu3 %vm541_vm1, %v623_v49 }
 0x337   : > { %v1025_v51 = vpop.eup %1024 }
 0x338   : > { %v622_v52 = vmul.f32 %v1025_v51, %v1009_v26 }
 0x339   : > { %v708_v11 = vpop.permute.xlu2 %707 }
 0x33a   : > { %911 = vmatpush.xpose.msk.msra.mxu3 %vm541_vm1, %v622_v52 }
 0x33d   : > { %912 = vmatmul.msk.f32.vlgmr.msra.gmra.mxu3 %vm541_vm1, %v432_v50 }
 0x341   : > { %v713_v14 = vpop.permute.xlu2 %712 }
 0x345   : > { %913 = vmatmul.msk.f32.gmra.mxu3 %vm541_vm1, %v435_v53 }
 0x34d   : > { %914 = vmatmul.msk.f32.gmra.mxu3 %vm541_vm1, %v438_v54 }
 0x355   : > { %915 = vmatmul.msk.f32.gmra.mxu3 %vm541_vm1, %v441_v55 }
 0x38b   : > { %v703_v8 = vpop.permute.xlu1 %702 }
 0x3c0   : > { %v683_v56 = vpop.f32.mrf.mxu3 }
 0x3c8   : > { %v686_v57 = vpop.f32.mrf.mxu3 }
 0x3d0   : > { %v689_v58 = vpop.f32.mrf.mxu3 }
 0x3d8   : > { %v692_v61 = vpop.f32.mrf.mxu3 }
 0x3d9   : > { %739 = vmatpush.msrb.mxu0 %v692_v61 }
 0x3db   : > { %740 = vmatpush.msrb.mxu0 %v689_v58 }
 0x3dd   : > { %741 = vmatpush.msrb.mxu0 %v686_v57 }
 0x3df   : > { %742 = vmatpush.msrb.mxu0 %v683_v56 }
 0x3e0   : > { %916 = vmatmul.msk.f32.vlgmr.msrb.gmra.mxu0 %vm337_vm0, %v321_v63 }
 0x3e8   : > { %917 = vmatmul.msk.f32.gmra.mxu0 %vm337_vm0, %v322_v1 }
 0x3f0   : > { %918 = vmatmul.msk.f32.gmra.mxu0 %vm337_vm0, %v323_v3 }
 0x3f8   : > { %919 = vmatmul.msk.f32.gmra.mxu0 %vm337_vm0, %v324_v4 }
 0x45d   : > { %v744_v5 = vpop.f32.mrf.mxu0 }
 0x45e   : > { %v745_v7 = vadd.f32 %v744_v5, %v698_v6 }
 0x460   : > { %756 = vst.msk [vmem:[%s303_s13] sm:$0xff] %vm541_vm1, %v745_v7 }
 0x465   : > { %v747_v9 = vpop.f32.mrf.mxu0 }
 0x466   : > { %v748_v10 = vadd.f32 %v747_v9, %v703_v8 }
 0x468   : > { %757 = vst.msk [vmem:[%s303_s13 + $0x8] sm:$0xff] %vm541_vm1, %v748_v10 }
 0x46d   : > { %v750_v12 = vpop.f32.mrf.mxu0 }
 0x46e   : > { %v751_v13 = vadd.f32 %v750_v12, %v708_v11 }
 0x470   : > { %758 = vst.msk [vmem:[%s303_s13 + $0x10] sm:$0xff] %vm541_vm1, %v751_v13 }
 0x475   : > { %v753_v15 = vpop.f32.mrf.mxu0 }
 0x476   : > { %v754_v16 = vadd.f32 %v753_v15, %v713_v14 }
 0x478   : > { %759 = vst.msk [vmem:[%s303_s13 + $0x18] sm:$0xff] %vm541_vm1, %v754_v16 }
 0x479   : > { %1113 = shalt.err (!%p1110_p12)
}
 0x47a   : > { %s1162_s19 = smov 128   ;;  %s1163_s13 = smov 8  }
 0x47b   : > { %934 = dma.vmem_to_hbm [thread:$0]  (%p1268_p3), %s774_s12, 512, %s776_s14, %s761_s15, %s1162_s19, %s1162_s19, %s1163_s13  }
 0x47c PF: > { %s790_s8 = sand.u32 1, %s1144_s21   ;;  %p1484_p13 = scmp.ge.s32.totalorder %s1156_s24, 2 }
 0x47d   : > { %s791_s26 = scalar_lea.sflag [#allocation4], %s790_s8 }
 0x47e   : > { %p945_p0 = pnand %p1484_p13, %p1234_p6 }
 0x480   : > { %p946_p5 = pneg %p945_p0 }
 0x482   : > { %1139 = dma.done.wait (%p946_p5), %s791_s26, 512  }
 0x483   : > { %1141 = vsyncadd (%p946_p5), %s791_s26, 4294966784  ;;  %p20_p7 = scmp.ge.s32.totalorder %s1252_s11, 4   ;;  %s1485_s21 = smov %s1148_s22 }
 0x484   : > { %s1486_s22 = smov %s1152_s23  ;;  %s1487_s23 = smov %s1264_s16 }
 0x485   : > { %s1488_s24 = smov %s1252_s11  ;;  %22 = sbr.rel (!%p20_p7) target bundleno = 6 (0x6), region = 96 }
 0x48a   :  { %797 = vsyncpa [#allocation3], 1 }
 0x48b   :  { %799 = vsyncpa [#allocation3 + $0x1], 1 }
 0x48c   :  { %800 = vsyncpa [#allocation6], 1 }
 0x48d   :  { %801 = vsyncpa [#allocation4], 1 }
 0x48e   :  { %803 = vsyncpa [#allocation4 + $0x1], 1 }

</bundles_post_ra>
